<compile_context>
chip_gen: v5e
topology: v5e:2x2
jax: 0.10.0
libtpu: 0.0.40
codegen_flags: <defaults>
</compile_context>

<pallas_src>
import jax
import jax.numpy as jnp
from jax.experimental import pallas as pl
from jax.experimental.pallas import tpu as pltpu


_VMEM_TILE_BUDGET = 32 * 1024 * 1024   # conservative tile budget across v5e/v6e/v7x
_VMEM_LIMIT_BYTES = 48 * 1024 * 1024   # raises v5e's 16 MiB scoped default, < v7x 64 MiB physical


def _round_up(x: int, m: int) -> int:
    return ((x + m - 1) // m) * m


def _logistic_regression_kernel(x_ref, w_ref, b_ref, o_ref):
    # x_ref: [TB, in_dim], w_ref: [in_dim, n_class] (K-major), b_ref: [1, n_class]
    # Plain [TB,K]@[K,N] MXU matmul with f32 accumulation, then broadcast-add bias.
    acc = jnp.dot(x_ref[...], w_ref[...], preferred_element_type=jnp.float32)
    o_ref[...] = (acc + b_ref[...]).astype(o_ref.dtype)


def prepare_logistic_params(weight, bias):
    """One-time layout prep (call once at model init, NOT per forward call).

    weight: [n_class, in_dim] (PyTorch nn.Linear layout), bias: [n_class]
    -> (w_kmajor [in_dim, n_class], bias_row [1, n_class]) materialized on device.
    """
    w_kmajor = jnp.asarray(weight).T
    bias_row = jnp.asarray(bias).reshape(1, -1)
    return jax.block_until_ready((w_kmajor, bias_row))


def _pick_batch_tile(B, in_dim, n_class, itemsize, batch_tile):
    # VMEM model: 2 double-buffered x tiles + 2 out tiles (per-row bytes) plus
    # resident weight/bias (counted at 2 buffers to stay conservative even if
    # the single-buffer request is honored).
    resident = 2 * (in_dim * n_class + n_class) * itemsize
    per_row = 2 * (in_dim + n_class) * itemsize
    tb = max(8, ((_VMEM_TILE_BUDGET - resident) // max(per_row, 1)) // 8 * 8)
    tb = min(tb, batch_tile)
    if B > 8:
        # Guarantee >=2 grid steps so the "parallel" batch axis feeds both
        # TensorCores on v7x (neutral on v5e/v6e).
        tb = min(tb, _round_up(-(-B // 2), 8))
    if B < 8:
        return B                      # full-dim block, no masking needed
    return max(8, min(tb, _round_up(B, 8)))


def logistic_regression(x, w_kmajor, bias_row, *, batch_tile: int = 1024,
                        vmem_limit_bytes: int = _VMEM_LIMIT_BYTES):
    """x: [B, in_dim], w_kmajor: [in_dim, n_class], bias_row: [1, n_class]
    -> [B, n_class]  (use prepare_logistic_params to build w_kmajor/bias_row once)."""
    B, in_dim = x.shape
    in_dim_w, n_class = w_kmajor.shape
    assert in_dim == in_dim_w
    assert bias_row.shape == (1, n_class)

    tb = _pick_batch_tile(B, in_dim, n_class, jnp.dtype(x.dtype).itemsize, batch_tile)
    grid = (pl.cdiv(B, tb),)   # ragged last block handled by Pallas write-masking

    def _call(single_buffer_resident):
        resident_kw = (
            dict(pipeline_mode=pl.Buffered(1)) if single_buffer_resident else {}
        )
        return pl.pallas_call(
            _logistic_regression_kernel,
            out_shape=jax.ShapeDtypeStruct((B, n_class), x.dtype),
            grid_spec=pltpu.PrefetchScalarGridSpec(
                num_scalar_prefetch=0,
                grid=grid,
                in_specs=[
                    # x streams along the batch grid axis (double-buffered).
                    pl.BlockSpec((tb, in_dim), lambda i: (i, 0)),
                    # weight / bias: same block every step -> VMEM-resident,
                    # DMA'd once; single-buffered to save VMEM for the x tile.
                    pl.BlockSpec((in_dim, n_class), lambda i: (0, 0), **resident_kw),
                    pl.BlockSpec((1, n_class), lambda i: (0, 0), **resident_kw),
                ],
                out_specs=pl.BlockSpec((tb, n_class), lambda i: (i, 0)),
            ),
            compiler_params=pltpu.CompilerParams(
                # Batch steps are independent -> shard across TCs on v7x.
                dimension_semantics=("parallel",),
                vmem_limit_bytes=vmem_limit_bytes,
            ),
        )(x, w_kmajor, bias_row)

    try:
        return _call(True)
    except Exception:
        # Fallback if single-buffering via pipeline_mode is rejected by this
        # jax/Mosaic version; identical semantics, default double-buffered W.
        return _call(False)


if __name__ == "__main__":
    key = jax.random.PRNGKey(0)
    k_x, k_w, k_b, k_x2 = jax.random.split(key, 4)

    batch, in_dim, n_class = 8, 32, 16  # small shapes consistent with Linear(in_dim, n_class)

    x = jax.random.normal(k_x, (batch, in_dim), dtype=jnp.float32)
    bound = 1.0 / (in_dim ** 0.5)
    weight = jax.random.uniform(k_w, (n_class, in_dim), minval=-bound, maxval=bound,
                                dtype=jnp.float32)
    bias = jax.random.uniform(k_b, (n_class,), minval=-bound, maxval=bound,
                              dtype=jnp.float32)

    # One-time layout prep (hoisted out of the per-call path).
    w_kmajor, bias_row = prepare_logistic_params(weight, bias)

    out = logistic_regression(x, w_kmajor, bias_row)
    jax.block_until_ready(out)

    ref = x @ weight.T + bias
    assert out.shape == (batch, n_class)
    assert jnp.allclose(out, ref, atol=1e-5, rtol=1e-5)

    # Exercise the no-pad ragged-last-block path (B % tb != 0).
    batch2 = 20
    x2 = jax.random.normal(k_x2, (batch2, in_dim), dtype=jnp.float32)
    out2 = logistic_regression(x2, w_kmajor, bias_row, batch_tile=16)
    jax.block_until_ready(out2)
    ref2 = x2 @ weight.T + bias
    assert out2.shape == (batch2, n_class)
    assert jnp.allclose(out2, ref2, atol=1e-5, rtol=1e-5)

    print("KERNEL_OK")
</pallas_src>

<mosaic_0001>
module attributes {stable_mosaic.version = 11 : i64} {
  func.func @_logistic_regression_kernel(%arg0: i32, %arg1: memref<8x32xf32, #tpu.memory_space<vmem>>, %arg2: memref<32x16xf32, #tpu.memory_space<vmem>>, %arg3: memref<1x16xf32, #tpu.memory_space<vmem>>, %arg4: memref<8x16xf32, #tpu.memory_space<vmem>>) attributes {dimension_semantics = [#tpu.dimension_semantics<parallel>], iteration_bounds = array<i64: 1>, scalar_prefetch = 0 : i64, scratch_operands = 0 : i64, tpu.core_type = #tpu.core_type<tc>, window_params = [{transform_indices = @transform_0, window_bounds = array<i64: 8, 32>}, {pipeline_mode = #tpu.pipeline_mode<synchronous>, transform_indices = @transform_1, window_bounds = array<i64: 32, 16>}, {pipeline_mode = #tpu.pipeline_mode<synchronous>, transform_indices = @transform_2, window_bounds = array<i64: 1, 16>}, {transform_indices = @transform_3, window_bounds = array<i64: 8, 16>}]} {
    %c0 = arith.constant 0 : index
    %c0_0 = arith.constant 0 : index
    %0 = vector.load %arg1[%c0, %c0_0] : memref<8x32xf32, #tpu.memory_space<vmem>>, vector<8x32xf32>
    %c0_1 = arith.constant 0 : index
    %c0_2 = arith.constant 0 : index
    %1 = vector.load %arg2[%c0_1, %c0_2] : memref<32x16xf32, #tpu.memory_space<vmem>>, vector<32x16xf32>
    %cst = arith.constant dense<0.000000e+00> : vector<8x16xf32>
    %2 = tpu.matmul %0, %1, %cst {dimension_numbers = #tpu.dot_dimension_numbers<[1], [0], [0], [1], [0, 0, 1, 1], [], []>} : vector<8x32xf32>, vector<32x16xf32>, vector<8x16xf32> -> vector<8x16xf32>
    %c0_3 = arith.constant 0 : index
    %c0_4 = arith.constant 0 : index
    %3 = vector.load %arg3[%c0_3, %c0_4] : memref<1x16xf32, #tpu.memory_space<vmem>>, vector<1x16xf32>
    %4 = vector.broadcast %3 : vector<1x16xf32> to vector<8x16xf32>
    %5 = arith.addf %2, %4 : vector<8x16xf32>
    %c0_5 = arith.constant 0 : index
    %c0_6 = arith.constant 0 : index
    %6 = vector.load %arg4[%c0_5, %c0_6] : memref<8x16xf32, #tpu.memory_space<vmem>>, vector<8x16xf32>
    tpu.vector_store %arg4[%c0_5, %c0_6], %5 {strides = array<i32>} : memref<8x16xf32, #tpu.memory_space<vmem>>, vector<8x16xf32>,
    return
  }
  func.func @transform_0(%arg0: i32) -> (i32, i32) {
    %c0_i32 = arith.constant 0 : i32
    %c0_i32_0 = arith.constant 0 : i32
    return %arg0, %c0_i32 : i32, i32
  }
  func.func @transform_1(%arg0: i32) -> (i32, i32) {
    %c0_i32 = arith.constant 0 : i32
    %c0_i32_0 = arith.constant 0 : i32
    %c0_i32_1 = arith.constant 0 : i32
    return %c0_i32, %c0_i32_0 : i32, i32
  }
  func.func @transform_2(%arg0: i32) -> (i32, i32) {
    %c0_i32 = arith.constant 0 : i32
    %c0_i32_0 = arith.constant 0 : i32
    %c0_i32_1 = arith.constant 0 : i32
    return %c0_i32, %c0_i32_0 : i32, i32
  }
  func.func @transform_3(%arg0: i32) -> (i32, i32) {
    %c0_i32 = arith.constant 0 : i32
    %c0_i32_0 = arith.constant 0 : i32
    return %arg0, %c0_i32 : i32, i32
  }
}

module attributes {stable_mosaic.version = 11 : i64} {
  func.func @_logistic_regression_kernel(%arg0: i32, %arg1: memref<8x32xf32, #tpu.memory_space<vmem>>, %arg2: memref<32x16xf32, #tpu.memory_space<vmem>>, %arg3: memref<1x16xf32, #tpu.memory_space<vmem>>, %arg4: memref<8x16xf32, #tpu.memory_space<vmem>>) attributes {dimension_semantics = [#tpu.dimension_semantics<parallel>], iteration_bounds = array<i64: 1>, scalar_prefetch = 0 : i64, scratch_operands = 0 : i64, tpu.core_type = #tpu.core_type<tc>, window_params = [{transform_indices = @transform_0, window_bounds = array<i64: 8, 32>}, {pipeline_mode = #tpu.pipeline_mode<synchronous>, transform_indices = @transform_1, window_bounds = array<i64: 32, 16>}, {pipeline_mode = #tpu.pipeline_mode<synchronous>, transform_indices = @transform_2, window_bounds = array<i64: 1, 16>}, {transform_indices = @transform_3, window_bounds = array<i64: 8, 16>}]} {
    %c0 = arith.constant 0 : index
    %c0_0 = arith.constant 0 : index
    %0 = vector.load %arg1[%c0, %c0_0] : memref<8x32xf32, #tpu.memory_space<vmem>>, vector<8x32xf32>
    %c0_1 = arith.constant 0 : index
    %c0_2 = arith.constant 0 : index
    %1 = vector.load %arg2[%c0_1, %c0_2] : memref<32x16xf32, #tpu.memory_space<vmem>>, vector<32x16xf32>
    %cst = arith.constant dense<0.000000e+00> : vector<8x16xf32>
    %2 = tpu.matmul %0, %1, %cst {dimension_numbers = #tpu.dot_dimension_numbers<[1], [0], [0], [1], [0, 0, 1, 1], [], []>} : vector<8x32xf32>, vector<32x16xf32>, vector<8x16xf32> -> vector<8x16xf32>
    %c0_3 = arith.constant 0 : index
    %c0_4 = arith.constant 0 : index
    %3 = vector.load %arg3[%c0_3, %c0_4] : memref<1x16xf32, #tpu.memory_space<vmem>>, vector<1x16xf32>
    %4 = vector.broadcast %3 : vector<1x16xf32> to vector<8x16xf32>
    %5 = arith.addf %2, %4 : vector<8x16xf32>
    %c0_5 = arith.constant 0 : index
    %c0_6 = arith.constant 0 : index
    %6 = vector.load %arg4[%c0_5, %c0_6] : memref<8x16xf32, #tpu.memory_space<vmem>>, vector<8x16xf32>
    tpu.vector_store %arg4[%c0_5, %c0_6], %5 {strides = array<i32>} : memref<8x16xf32, #tpu.memory_space<vmem>>, vector<8x16xf32>,
    return
  }
  func.func @transform_0(%arg0: i32) -> (i32, i32) {
    %c0_i32 = arith.constant 0 : i32
    %c0_i32_0 = arith.constant 0 : i32
    return %arg0, %c0_i32 : i32, i32
  }
  func.func @transform_1(%arg0: i32) -> (i32, i32) {
    %c0_i32 = arith.constant 0 : i32
    %c0_i32_0 = arith.constant 0 : i32
    %c0_i32_1 = arith.constant 0 : i32
    return %c0_i32, %c0_i32_0 : i32, i32
  }
  func.func @transform_2(%arg0: i32) -> (i32, i32) {
    %c0_i32 = arith.constant 0 : i32
    %c0_i32_0 = arith.constant 0 : i32
    %c0_i32_1 = arith.constant 0 : i32
    return %c0_i32, %c0_i32_0 : i32, i32
  }
  func.func @transform_3(%arg0: i32) -> (i32, i32) {
    %c0_i32 = arith.constant 0 : i32
    %c0_i32_0 = arith.constant 0 : i32
    return %arg0, %c0_i32 : i32, i32
  }
}

</mosaic_0001>

<bundles_post_ra>
// kernel: tpu_custom_call.1
= control target key start
LH: loop header
LB: loop body
LE: loop exit
PB: predicated region body
PF: predicated region fallthrough
CT: control target
= control target key end

     0   :  { %s137_s0 = inlined_call_operand.vmem [shape: f32[8,32], index: 0, kind: input, shape index: {}]   ;;  %s138_s1 = inlined_call_operand.vmem [shape: f32[32,16], index: 1, kind: input, shape index: {}]   ;;  %s139_s2 = inlined_call_operand.vmem [shape: f32[1,16], index: 2, kind: input, shape index: {}]   ;;  %s140_s3 = inlined_call_operand.hbm [shape: f32[8,16], index: 3, kind: output, shape index: {}]  }
   0x1   :  { %v19_v0 = vld [vmem:[%s138_s1 + $0x18] sm:$0xff]  ;;  %v18_v1 = vld [vmem:[%s138_s1 + $0x10] sm:$0xff]  ;;  %v17_v2 = vld [vmem:[%s138_s1 + $0x8] sm:$0xff] }
   0x2   :  { %40 = vmatpush.msra.mxu0 %v19_v0 }
   0x3   :  { %8 = vsyncpa [#allocation3], 0  ;;  %v16_v3 = vld [vmem:[%s138_s1] sm:$0xff]  ;;  %vm24_vm0 = vcmask 261120   ;;  %s95_s24 = smov [#allocation2]   ;;  %s57_s28 = sshll.u32 %s140_s3, 4  ;;  %s58_s28 = int_to_ptr.hbm [resolvable:$true] %s57_s28 }
   0x4   :  { %41 = vmatpush.msra.mxu0 %v18_v1  ;;  %v15_v4 = vld [vmem:[%s137_s0] sm:$0xff]  ;;  %s55_s25 = sshll.u32 %s95_s24, 4  ;;  %vm48_vm1 = vcmask 130048   ;;  %s56_s25 = int_to_ptr.vmem [resolvable:$true] %s55_s25 }
   0x5   :  { %v68_v5 = vld [vmem:[%s139_s2] ss:$0 sm:$0xff] }
   0x6   :  { %42 = vmatpush.msra.mxu0 %v17_v2 }
   0x8   :  { %43 = vmatpush.msra.mxu0 %v16_v3 }
   0x9   :  { %66 = vmatmul.msk.f32.vlgmr.msra.gmra.mxu0 %vm24_vm0, %v15_v4 }
  0x86   :  { %v45_v6 = vpop.f32.mrf.mxu0 }
  0x87   :  { %v46_v7 = vadd.f32 %v68_v5, %v45_v6 }
  0x89   :  { %49 = vst.msk [vmem:[#allocation2] sm:$0xff] %vm48_vm1, %v46_v7 }
  0x8a   :  { %60 = dma.vmem_to_hbm [thread:$0]  %s56_s25, 128, %s58_s28, [#allocation3]  }
  0x8b   :  { %93 = dma.done.wait [#allocation3], 128  }
  0x8c   :  { %94 = vsyncadd [#allocation3], 4294967168 }
  0x8d   :  { %65 = vsyncpa [#allocation3], 1 }

// kernel: tpu_custom_call.1
= control target key start
LH: loop header
LB: loop body
LE: loop exit
PB: predicated region body
PF: predicated region fallthrough
CT: control target
= control target key end

     0   :  { %s137_s0 = inlined_call_operand.vmem [shape: f32[8,32], index: 0, kind: input, shape index: {}]   ;;  %s138_s1 = inlined_call_operand.vmem [shape: f32[32,16], index: 1, kind: input, shape index: {}]   ;;  %s139_s2 = inlined_call_operand.vmem [shape: f32[1,16], index: 2, kind: input, shape index: {}]   ;;  %s140_s3 = inlined_call_operand.hbm [shape: f32[8,16], index: 3, kind: output, shape index: {}]  }
   0x1   :  { %v19_v0 = vld [vmem:[%s138_s1 + $0x18] sm:$0xff]  ;;  %v18_v1 = vld [vmem:[%s138_s1 + $0x10] sm:$0xff]  ;;  %v17_v2 = vld [vmem:[%s138_s1 + $0x8] sm:$0xff] }
   0x2   :  { %40 = vmatpush.msra.mxu0 %v19_v0 }
   0x3   :  { %8 = vsyncpa [#allocation3], 0  ;;  %v16_v3 = vld [vmem:[%s138_s1] sm:$0xff]  ;;  %vm24_vm0 = vcmask 261120   ;;  %s95_s24 = smov [#allocation2]   ;;  %s57_s28 = sshll.u32 %s140_s3, 4  ;;  %s58_s28 = int_to_ptr.hbm [resolvable:$true] %s57_s28 }
   0x4   :  { %41 = vmatpush.msra.mxu0 %v18_v1  ;;  %v15_v4 = vld [vmem:[%s137_s0] sm:$0xff]  ;;  %s55_s25 = sshll.u32 %s95_s24, 4  ;;  %vm48_vm1 = vcmask 130048   ;;  %s56_s25 = int_to_ptr.vmem [resolvable:$true] %s55_s25 }
   0x5   :  { %v68_v5 = vld [vmem:[%s139_s2] ss:$0 sm:$0xff] }
   0x6   :  { %42 = vmatpush.msra.mxu0 %v17_v2 }
   0x8   :  { %43 = vmatpush.msra.mxu0 %v16_v3 }
   0x9   :  { %66 = vmatmul.msk.f32.vlgmr.msra.gmra.mxu0 %vm24_vm0, %v15_v4 }
  0x86   :  { %v45_v6 = vpop.f32.mrf.mxu0 }
  0x87   :  { %v46_v7 = vadd.f32 %v68_v5, %v45_v6 }
  0x89   :  { %49 = vst.msk [vmem:[#allocation2] sm:$0xff] %vm48_vm1, %v46_v7 }
  0x8a   :  { %60 = dma.vmem_to_hbm [thread:$0]  %s56_s25, 128, %s58_s28, [#allocation3]  }
  0x8b   :  { %93 = dma.done.wait [#allocation3], 128  }
  0x8c   :  { %94 = vsyncadd [#allocation3], 4294967168 }
  0x8d   :  { %65 = vsyncpa [#allocation3], 1 }

</bundles_post_ra>
